<compile_context>
chip_gen: v7x
topology: tpu7x:2x2x1
jax: 0.10.0
libtpu: 0.0.40
codegen_flags: <defaults>
</compile_context>

<pallas_src>
import jax
import jax.numpy as jnp
from jax.experimental import pallas as pl
from jax.experimental.pallas import tpu as pltpu


def _temp_scale_kernel(t_ref, x_ref, w_ref, b_ref, o_ref, acc_ref):
    # t_ref  : SMEM (1,)    f32  temperature (whole array, no tiling)
    # x_ref  : VMEM (tm,tk) bf16 input tile
    # w_ref  : VMEM (tk,tn) bf16 weight tile
    # b_ref  : VMEM (1, tn) f32  bias tile
    # o_ref  : VMEM (tm,tn) f32  output tile (resident across the K axis)
    # acc_ref: VMEM (tm,tn) f32  accumulator scratch
    k = pl.program_id(2)

    @pl.when(k == 0)
    def _():
        acc_ref[...] = jnp.zeros_like(acc_ref)

    acc_ref[...] += jnp.dot(
        x_ref[...], w_ref[...], preferred_element_type=jnp.float32
    )

    @pl.when(k == pl.num_programs(2) - 1)
    def _():
        inv_t = 1.0 / t_ref[0]                       # scalar reciprocal
        o_ref[...] = (acc_ref[...] + b_ref[...]) * inv_t


def _pad_to_multiples(a, mults):
    pads = [(0, (-d) % m) for d, m in zip(a.shape, mults)]
    if any(p[1] for p in pads):
        a = jnp.pad(a, pads)
    return a


def model_with_temperature_forward(x, w, b, temperature, *, tm=128, tn=128, tk=128):
    """Fused forward: linear classifier -> temperature scaling.

    x: (B, F) f32, w: (F, C) f32, b: (C,) f32, temperature: (1,) f32
    returns (B, C) f32 == (x @ w + b) / temperature
    """
    B, F = x.shape
    F2, C = w.shape
    assert F == F2, "weight/input feature mismatch"

    # bf16 operands for the MXU; bias / accumulate / epilogue stay f32.
    xp = _pad_to_multiples(x.astype(jnp.bfloat16), (tm, tk))
    wp = _pad_to_multiples(w.astype(jnp.bfloat16), (tk, tn))
    bp = _pad_to_multiples(b.reshape(1, C).astype(jnp.float32), (1, tn))
    t1 = temperature.reshape(1).astype(jnp.float32)

    Bp, Fp = xp.shape
    _, Cp = wp.shape
    grid = (Bp // tm, Cp // tn, Fp // tk)

    out_padded = pl.pallas_call(
        _temp_scale_kernel,
        out_shape=jax.ShapeDtypeStruct((Bp, Cp), jnp.float32),
        grid_spec=pltpu.PrefetchScalarGridSpec(
            num_scalar_prefetch=0,
            grid=grid,
            in_specs=[
                # temperature scalar lives in SMEM, passed whole to every step
                pl.BlockSpec(memory_space=pltpu.MemorySpace.SMEM),
                pl.BlockSpec((tm, tk), lambda i, j, k: (i, k)),   # x  tile
                pl.BlockSpec((tk, tn), lambda i, j, k: (k, j)),   # W  tile
                pl.BlockSpec((1, tn), lambda i, j, k: (0, j)),    # b  tile
            ],
            out_specs=pl.BlockSpec((tm, tn), lambda i, j, k: (i, j)),
            scratch_shapes=[pltpu.VMEM((tm, tn), jnp.float32)],
        ),
        compiler_params=pltpu.CompilerParams(
            # M, N parallel (v7x megacore sharding), K is the reduction axis.
            dimension_semantics=("parallel", "parallel", "arbitrary"),
            vmem_limit_bytes=32 * 1024 * 1024,
        ),
    )(t1, xp, wp, bp)

    return out_padded[:B, :C]


def _reference(x, w, b, temperature):
    # Same math / dtypes as the kernel: bf16 operands, f32 accumulation.
    logits = jnp.dot(
        x.astype(jnp.bfloat16), w.astype(jnp.bfloat16),
        preferred_element_type=jnp.float32,
    ) + b[None, :].astype(jnp.float32)
    return logits / temperature[0]


if __name__ == "__main__":
    key = jax.random.PRNGKey(0)

    # nn.Parameter(torch.ones(1) * 1.5)
    temperature = jnp.ones((1,), dtype=jnp.float32) * 1.5

    # Case 1: shapes that exercise the full 3-D grid (2 x 2 x 3 tiles).
    B, F, C = 256, 384, 256
    kx, kw, kb = jax.random.split(key, 3)
    x = jax.random.normal(kx, (B, F), dtype=jnp.float32)
    w = jax.random.normal(kw, (F, C), dtype=jnp.float32) * 0.05
    b = jax.random.normal(kb, (C,), dtype=jnp.float32) * 0.01

    out = jax.block_until_ready(model_with_temperature_forward(x, w, b, temperature))
    ref = _reference(x, w, b, temperature)
    assert out.shape == (B, C)
    assert jnp.allclose(out, ref, atol=1e-4, rtol=1e-4), "mismatch vs bf16 reference"
    # Sanity against full-f32 math (bf16 operand rounding only).
    ref_f32 = (x @ w + b[None, :]) / temperature[0]
    assert jnp.allclose(out, ref_f32, atol=5e-2, rtol=5e-2), "mismatch vs f32 reference"

    # Case 2: small / non-tile-aligned shapes exercise the padding path.
    B2, F2, C2 = 8, 32, 130
    k2x, k2w, k2b = jax.random.split(jax.random.PRNGKey(1), 3)
    x2 = jax.random.normal(k2x, (B2, F2), dtype=jnp.float32)
    w2 = jax.random.normal(k2w, (F2, C2), dtype=jnp.float32) * 0.05
    b2 = jax.random.normal(k2b, (C2,), dtype=jnp.float32) * 0.01

    out2 = jax.block_until_ready(
        model_with_temperature_forward(x2, w2, b2, temperature)
    )
    ref2 = _reference(x2, w2, b2, temperature)
    assert out2.shape == (B2, C2)
    assert jnp.allclose(out2, ref2, atol=1e-4, rtol=1e-4), "mismatch (padded case)"

    # TODO(synk): set_temperature (LBFGS NLL calibration) is an optimizer loop,
    # not a forward-pass op; intentionally not implemented as a kernel.
    print("KERNEL_OK")
</pallas_src>

<mosaic_0001>
module attributes {stable_mosaic.version = 11 : i64} {
  func.func @_temp_scale_kernel(%arg0: i32, %arg1: i32, %arg2: i32, %arg3: memref<1xf32, #tpu.memory_space<smem>>, %arg4: memref<128x128xbf16, #tpu.memory_space<vmem>>, %arg5: memref<128x128xbf16, #tpu.memory_space<vmem>>, %arg6: memref<1x128xf32, #tpu.memory_space<vmem>>, %arg7: memref<128x128xf32, #tpu.memory_space<vmem>>, %arg8: memref<128x128xf32, #tpu.memory_space<vmem>>) attributes {dimension_semantics = [#tpu.dimension_semantics<parallel>, #tpu.dimension_semantics<parallel>, #tpu.dimension_semantics<arbitrary>], iteration_bounds = array<i64: 2, 2, 3>, scalar_prefetch = 0 : i64, scratch_operands = 1 : i64, tpu.core_type = #tpu.core_type<tc>, window_params = [{transform_indices = @transform_0, window_bounds = array<i64: 1>}, {transform_indices = @transform_1, window_bounds = array<i64: 128, 128>}, {transform_indices = @transform_2, window_bounds = array<i64: 128, 128>}, {transform_indices = @transform_3, window_bounds = array<i64: 1, 128>}, {transform_indices = @transform_4, window_bounds = array<i64: 128, 128>}]} {
    %c0_i32 = arith.constant 0 : i32
    %0 = arith.cmpi eq, %arg2, %c0_i32 : i32
    %1 = arith.extui %0 : i1 to i32
    %c0_i32_0 = arith.constant 0 : i32
    %2 = arith.cmpi ne, %1, %c0_i32_0 : i32
    scf.if %2 {
      %cst_9 = arith.constant 0.000000e+00 : f32
      %12 = vector.broadcast %cst_9 : f32 to vector<128x128xf32>
      %c0_10 = arith.constant 0 : index
      %c0_11 = arith.constant 0 : index
      %13 = vector.load %arg8[%c0_10, %c0_11] : memref<128x128xf32, #tpu.memory_space<vmem>>, vector<128x128xf32>
      tpu.vector_store %arg8[%c0_10, %c0_11], %12 {strides = array<i32>} : memref<128x128xf32, #tpu.memory_space<vmem>>, vector<128x128xf32>,
    } else {
    }
    %c0 = arith.constant 0 : index
    %c0_1 = arith.constant 0 : index
    %3 = vector.load %arg8[%c0, %c0_1] : memref<128x128xf32, #tpu.memory_space<vmem>>, vector<128x128xf32>
    %c0_2 = arith.constant 0 : index
    %c0_3 = arith.constant 0 : index
    %4 = vector.load %arg4[%c0_2, %c0_3] : memref<128x128xbf16, #tpu.memory_space<vmem>>, vector<128x128xbf16>
    %c0_4 = arith.constant 0 : index
    %c0_5 = arith.constant 0 : index
    %5 = vector.load %arg5[%c0_4, %c0_5] : memref<128x128xbf16, #tpu.memory_space<vmem>>, vector<128x128xbf16>
    %cst = arith.constant dense<0.000000e+00> : vector<128x128xf32>
    %6 = tpu.matmul %4, %5, %cst {dimension_numbers = #tpu.dot_dimension_numbers<[1], [0], [0], [1], [0, 0, 1, 1], [], []>} : vector<128x128xbf16>, vector<128x128xbf16>, vector<128x128xf32> -> vector<128x128xf32>
    %7 = arith.addf %3, %6 : vector<128x128xf32>
    %c0_6 = arith.constant 0 : index
    %c0_7 = arith.constant 0 : index
    %8 = vector.load %arg8[%c0_6, %c0_7] : memref<128x128xf32, #tpu.memory_space<vmem>>, vector<128x128xf32>
    tpu.vector_store %arg8[%c0_6, %c0_7], %7 {strides = array<i32>} : memref<128x128xf32, #tpu.memory_space<vmem>>, vector<128x128xf32>,
    %c2_i32 = arith.constant 2 : i32
    %9 = arith.cmpi eq, %arg2, %c2_i32 : i32
    %10 = arith.extui %9 : i1 to i32
    %c0_i32_8 = arith.constant 0 : i32
    %11 = arith.cmpi ne, %10, %c0_i32_8 : i32
    scf.if %11 {
      %c0_9 = arith.constant 0 : index
      %12 = memref.load %arg3[%c0_9] : memref<1xf32, #tpu.memory_space<smem>>
      %cst_10 = arith.constant 1.000000e+00 : f32
      %13 = arith.divf %cst_10, %12 : f32
      %c0_11 = arith.constant 0 : index
      %c0_12 = arith.constant 0 : index
      %14 = vector.load %arg8[%c0_11, %c0_12] : memref<128x128xf32, #tpu.memory_space<vmem>>, vector<128x128xf32>
      %c0_13 = arith.constant 0 : index
      %c0_14 = arith.constant 0 : index
      %15 = vector.load %arg6[%c0_13, %c0_14] : memref<1x128xf32, #tpu.memory_space<vmem>>, vector<1x128xf32>
      %16 = vector.broadcast %15 : vector<1x128xf32> to vector<128x128xf32>
      %17 = arith.addf %14, %16 : vector<128x128xf32>
      %18 = vector.broadcast %13 : f32 to vector<128x128xf32>
      %19 = arith.mulf %17, %18 : vector<128x128xf32>
      %c0_15 = arith.constant 0 : index
      %c0_16 = arith.constant 0 : index
      %20 = vector.load %arg7[%c0_15, %c0_16] : memref<128x128xf32, #tpu.memory_space<vmem>>, vector<128x128xf32>
      tpu.vector_store %arg7[%c0_15, %c0_16], %19 {strides = array<i32>} : memref<128x128xf32, #tpu.memory_space<vmem>>, vector<128x128xf32>,
    } else {
    }
    return
  }
  func.func @transform_0(%arg0: i32, %arg1: i32, %arg2: i32) -> i32 {
    %c0_i32 = arith.constant 0 : i32
    %c0_i32_0 = arith.constant 0 : i32
    return %c0_i32 : i32
  }
  func.func @transform_1(%arg0: i32, %arg1: i32, %arg2: i32) -> (i32, i32) {
    %c0_i32 = arith.constant 0 : i32
    return %arg0, %arg2 : i32, i32
  }
  func.func @transform_2(%arg0: i32, %arg1: i32, %arg2: i32) -> (i32, i32) {
    %c0_i32 = arith.constant 0 : i32
    return %arg2, %arg1 : i32, i32
  }
  func.func @transform_3(%arg0: i32, %arg1: i32, %arg2: i32) -> (i32, i32) {
    %c0_i32 = arith.constant 0 : i32
    %c0_i32_0 = arith.constant 0 : i32
    return %c0_i32, %arg1 : i32, i32
  }
  func.func @transform_4(%arg0: i32, %arg1: i32, %arg2: i32) -> (i32, i32) {
    %c0_i32 = arith.constant 0 : i32
    return %arg0, %arg1 : i32, i32
  }
}

</mosaic_0001>

<bundles_post_ra>
// kernel: tpu_custom_call.1
= control target key start
LH: loop header
LB: loop body
LE: loop exit
PB: predicated region body
PF: predicated region fallthrough
CT: control target
= control target key end

     0   :  { %s1809_s0 = inlined_call_operand.<no memory space> [shape: f32[1], index: 0, kind: input, shape index: {}]   ;;  %s1810_s1 = inlined_call_operand.hbm [shape: bf16[256,384], index: 1, kind: input, shape index: {}]   ;;  %s1811_s2 = inlined_call_operand.hbm [shape: bf16[384,256], index: 2, kind: input, shape index: {}]   ;;  %s1812_s3 = inlined_call_operand.vmem [shape: f32[1,256], index: 3, kind: input, shape index: {}]   ;;  %s1813_s4 = inlined_call_operand.hbm [shape: f32[256,256], index: 4, kind: output, shape index: {}]  }
   0x1   :  { %1830 = sst [smem:[#allocation22_spill]] %s1810_s1 }
   0x2   :  { %1831 = sst [smem:[#allocation23_spill]] %s1812_s3 }
   0x3   :  { %1832 = sst [smem:[#allocation24_spill]] %s1813_s4 }
   0x4   :  { %9 = sst [smem:[#allocation3]] %s1809_s0 }
   0x5   :  { %10 = vsyncpa [#allocation5], 0 }
   0x6   :  { %12 = vsyncpa [#allocation5 + $0x1], 0 }
   0x7   :  { %13 = vsyncpa [#allocation8], 0 }
   0x8   :  { %15 = vsyncpa [#allocation8 + $0x1], 0 }
   0x9   :  { %16 = vsyncpa [#allocation6], 0 }
   0xa   :  { %18 = vsyncpa [#allocation6 + $0x1], 0  ;;  %s1371_s17 = smov 0   ;;  %s1373_s18 = smov 0  }
   0xb   :  { %s1375_s19 = smov 0   ;;  %s1377_s20 = smov 0  }
   0xc   :  { %s1379_s21 = smov 0   ;;  %s1381_s22 = smov 0  }
   0xd   :  { %s1383_s23 = smov 0   ;;  %s1385_s0 = smov 0  }
   0xe   :  { %s1387_s24 = smov 0   ;;  %s1389_s25 = smov 0  }
   0xf   :  { %s1391_s26 = smov 0   ;;  %s1393_s27 = smov 0  }
  0x10   :  { %s1395_s28 = smov 0   ;;  %s1397_s29 = smov 0  }
  0x11   :  { %s1399_s30 = smov 0   ;;  %s1401_s5 = smov 0  }
  0x12 LB: > { %1833 = sst [smem:[#allocation13_spill]] %s1306_s25  ;;  %s821_s6 = sadd.s32 4294967295, %s1330_s5   ;;  %s1330_s5 = sphi %s1401_s5, %s24_s5   ;;  %s1326_s30 = sphi %s1399_s30, %s1880_s30   ;;  %s1322_s29 = sphi %s1397_s29, %s1893_s29   ;;  %s1318_s28 = sphi %s1395_s28, %s1892_s28   ;;  %s1314_s27 = sphi %s1393_s27, %s1877_s27   ;;  %s1310_s26 = sphi %s1391_s26, %s1891_s26   ;;  %s1306_s25 = sphi %s1389_s25, %s1890_s25   ;;  %s1302_s24 = sphi %s1387_s24, %s1889_s24   ;;  %s1298_s0 = sphi %s1385_s0, %s1888_s0   ;;  %s1294_s23 = sphi %s1383_s23, %s1887_s23   ;;  %s1290_s22 = sphi %s1381_s22, %s1886_s22   ;;  %s1286_s21 = sphi %s1379_s21, %s1885_s21   ;;  %s1282_s20 = sphi %s1377_s20, %s1884_s20   ;;  %s1278_s19 = sphi %s1375_s19, %s1883_s19   ;;  %s1274_s18 = sphi %s1373_s18, %s1882_s18   ;;  %s1270_s17 = sphi %s1371_s17, %s1881_s17  }
  0x13   : > { %1834 = sst [smem:[#allocation14_spill]] %s1310_s26  ;;  %s36_s7 = sadd.s32 1, %s1318_s28 }
  0x14   : > { %1835 = sst [smem:[#allocation15_spill]] %s1314_s27  ;;  %p1451_p0 = scmp.ge.s32.totalorder %s36_s7, 3 }
  0x15   : > { %1836 = sst [smem:[#allocation16_spill]] %s1326_s30  ;;  %p80_p1 = scmp.ne.s32.totalorder %s1302_s24, %s1298_s0 }
  0x16   : > { %s1895_s7 = smov (%p1451_p0, %s36_s7), 0  ;;  %p1817_p2 = scmp.eq.s32.totalorder %s1330_s5, 0 }
  0x17   : > { %1838 = sst [smem:[#allocation17_spill]] %s1895_s7  ;;  %p86_p3 = scmp.ne.s32.totalorder %s1298_s0, %s1294_s23 }
  0x18   : > { %s1467_s11 = ssub.s32 %s1318_s28, %s1895_s7  ;;  %p1469_p4 = scmp.eq.s32.totalorder %s821_s6, 0 }
  0x19   : > { %p82_p5 = por %p1817_p2, %p80_p1  ;;  %p1475_p6 = scmp.eq.s32.totalorder %s821_s6, 11 }
  0x1a   : > { %s1839_s12 = scalar_select %p1469_p4, 1, 0 }
  0x1b   : > { %s1840_s13 = scalar_select %p1475_p6, 1, 0 }
  0x1c   : > { %p1481_p7 = por %p1469_p4, %p86_p3  ;;  %p1816_p8 = scmp.lt.s32.totalorder %s1330_s5, 12 }
  0x1d   : > { %s195_s15 = sand.u32 1, %s1302_s24   ;;  %s928_s23 = smul.u32 48, %s1326_s30 }
  0x1e   : > { %s1841_s14 = scalar_select %p1481_p7, 1, 0 }
  0x1f   : > { %s825_s16 = sshll.u32 %s195_s15, 6  ;;  %p1490_p9 = pnand %p1816_p8, %p82_p5 }
  0x20   : > { %s199_s10 = scalar_lea.vmem [#allocation4], %s825_s16  ;;  %s205_s6 = sadd.s32 %s1318_s28, %s928_s23 }
  0x21   : > { %s208_s9 = sshll.u32 %s199_s10, 4  ;;  %s828_s4 = sshll.u32 %s205_s6, 6  ;;  %s1495_s9 = int_to_ptr.vmem [resolvable:$true] %s208_s9 }
  0x22   : > { %s1843_s1 = sld [smem:[#allocation22_spill]]  ;;  %s1502_s10 = scalar_lea.sflag [#allocation5], %s195_s15 }
  0x23   : > { %p1106_p11 = pneg %p1490_p9 }
  0x28   : > { %s1500_s3 = scalar_lea.hbm %s1843_s1, %s828_s4  ;;  %s1109_s25 = scalar_lea.hbm %s1843_s1, 6144 }
  0x29   : > { %s1104_s16 = scalar_lea.hbm %s1500_s3, 1024  ;;  %p1110_p1 = scmp.lt.u32.totalorder %s1500_s3, %s1843_s1 }
  0x2a   : > { %p1105_p10 = scmp.ne.s32.totalorder %s1500_s3, %s1104_s16  ;;  %p1111_p3 = scmp.lt.u32.totalorder %s1109_s25, %s1104_s16 }
  0x2b   : > { %p1113_p8 = scmp.lt.u32.totalorder %s1104_s16, %s1500_s3 }
  0x2c   : > { %p1107_p12 = pnand %p1106_p11, %p1105_p10  ;;  %p1112_p5 = por %p1111_p3, %p1110_p1 }
  0x2e   : > { %p1108_p13 = pneg %p1107_p12  ;;  %p1114_p2 = por %p1113_p8, %p1112_p5 }
  0x30   : > { %p1115_p7 = pnand %p1114_p2, %p1108_p13 }
  0x32   : > { %1118 = shalt.err (!%p1115_p7)
}
  0x33   : > { %s1119_s15 = scalar_lea.vmem %s1495_s9, 1024  ;;  %s1332_s23 = smov [#allocation4]  }
  0x34   : > { %p1120_p10 = scmp.ne.s32.totalorder %s1495_s9, %s1119_s15  ;;  %s1124_s6 = sshll.u32 %s1332_s23, 4  ;;  %s1125_s6 = int_to_ptr.vmem [resolvable:$false] %s1124_s6 }
  0x35   : > { %s1126_s4 = scalar_lea.vmem %s1125_s6, 2048  ;;  %p1127_p4 = scmp.lt.s32.totalorder %s1495_s9, %s1125_s6 }
  0x36   : > { %p1122_p12 = pnand %p1120_p10, %p1106_p11  ;;  %p1128_p1 = scmp.lt.s32.totalorder %s1126_s4, %s1119_s15 }
  0x38   : > { %p1123_p6 = pneg %p1122_p12  ;;  %p1129_p3 = por %p1128_p1, %p1127_p4 }
  0x3a   : > { %p1130_p8 = pnand %p1129_p3, %p1123_p6 }
  0x3c   : > { %1133 = shalt.err (!%p1130_p8)
}
  0x3d   : > { %s1333_s16 = smov 192   ;;  %s1820_s25 = smov 64  }
  0x3e   : > { %s1821_s27 = smov 4   ;;  %p833_p2 = scmp.ge.s32.totalorder %s1330_s5, 1 }
  0x3f   : > { %940 = dma.hbm_to_vmem [thread:$0]  (!%p1490_p9), %s1500_s3, 1024, %s1495_s9, %s1502_s10, %s1333_s16, %s1820_s25, %s1821_s27  }
  0x40   : > { %p245_p4 = scmp.lt.s32.totalorder %s1330_s5, 13  ;;  %s822_s23 = sadd.s32 4294967294, %s1330_s5  }
  0x41   : > { %s39_s6 = sadd.s32 1, %s1322_s29  ;;  %s101_s4 = sadd.s32 1, %s1290_s22 }
  0x42   : > { %p1534_p6 = pnand %p833_p2, %p245_p4  ;;  %s1897_s6 = smov (!%p1451_p0, %s39_s6), %s1322_s29 }
  0x43   : > { %p108_p7 = scmp.ne.s32.totalorder %s1290_s22, %s1286_s21  ;;  %p114_p9 = scmp.ne.s32.totalorder %s1286_s21, %s1282_s20 }
  0x44   : > { %p41_p11 = scmp.ge.s32.totalorder %s1897_s6, 2  ;;  %s155_s3 = sadd.s32 1, %s1278_s19 }
  0x45   : > { %p1845_p13 = scmp.eq.s32.totalorder %s1330_s5, 0  ;;  %p1847_p10 = scmp.ne.s32.totalorder %s1839_s12, 0 }
  0x46   : > { %s1899_s6 = smov (%p41_p11, %s1897_s6), 0  ;;  %s1850_s8 = sadd.s32 1, %s1326_s30 }
  0x47   : > { %p1551_p5 = por %p108_p7, %p1845_p13  ;;  %p1557_p12 = por %p114_p9, %p1847_p10 }
  0x48   : > { %1849 = sst [smem:[#allocation18_spill]] %s1899_s6  ;;  %s1901_s8 = smov (!%p41_p11, %s1850_s8), %s1326_s30 }
  0x49   : > { %s1848_s9 = scalar_select %p1557_p12, 1, 0 }
  0x4a   : > { %s97_s20 = ssub.s32 %s1322_s29, %s1899_s6  ;;  %p165_p0 = scmp.ne.s32.totalorder %s1278_s19, %s1274_s18 }
  0x4b   : > { %p45_p1 = scmp.ge.s32.totalorder %s1901_s8, 2  ;;  %s98_s10 = sor.u32 %s97_s20, %s1467_s11 }
  0x4c   : > { %p99_p3 = scmp.eq.s32.totalorder %s98_s10, 0  ;;  %p1851_p8 = scmp.ne.s32.totalorder %s1840_s13, 0 }
  0x4d   : > { %s1903_s8 = smov (%p45_p1, %s1901_s8), 0  ;;  %p171_p4 = scmp.ne.s32.totalorder %s1274_s18, %s1270_s17 }
  0x4e   : > { %p1573_p2 = por %p1851_p8, %p165_p0  ;;  %1854 = sst [smem:[#allocation20_spill]] %s1903_s8 }
  0x4f   : > { %s1580_s16 = scalar_select %p99_p3, %s1290_s22, %s101_s4  }
  0x50   : > { %s1852_s12 = scalar_select %p1573_p2, 1, 0 }
  0x51   : > { %1855 = sst [smem:[#allocation21_spill]] %s1580_s16  ;;  %s68_s25 = ssub.s32 %s1326_s30, %s1903_s8 }
  0x52   : > { %1853 = sst [smem:[#allocation19_spill]] %s1852_s12  ;;  %s70_s27 = sor.u32 %s1467_s11, %s68_s25 }
  0x53   : > { %s152_s1 = sor.u32 %s97_s20, %s68_s25  ;;  %p71_p7 = scmp.eq.s32.totalorder %s70_s27, 0 }
  0x54   : > { %p153_p9 = scmp.eq.s32.totalorder %s152_s1, 0  ;;  %p172_p11 = scmp.eq.s32.totalorder %s822_s23, 11 }
  0x55   : > { %s218_s13 = sand.u32 1, %s1290_s22   ;;  %s1856_s10 = sadd.s32 1, %s1302_s24 }
  0x56   : > { %s1591_s6 = scalar_select %p71_p7, %s1302_s24, %s1856_s10  }
  0x57   : > { %s1594_s12 = scalar_select %p153_p9, %s1278_s19, %s155_s3  }
  0x58   : > { %p1596_p13 = por %p172_p11, %p171_p4  ;;  %s829_s4 = sshll.u32 %s218_s13, 6 }
  0x59   : > { %s862_s8 = sshll.u32 %s1318_s28, 5  ;;  %s222_s25 = scalar_lea.vmem [#allocation7], %s829_s4 }
  0x5a   : > { %s1857_s26 = scalar_select %p1596_p13, 1, 0 }
  0x5b   : > { %s228_s30 = sadd.s32 %s1322_s29, %s862_s8  ;;  %s231_s20 = sshll.u32 %s222_s25, 4  ;;  %s1607_s20 = int_to_ptr.vmem [resolvable:$true] %s231_s20 }
  0x5c   : > { %s832_s11 = sshll.u32 %s228_s30, 6  ;;  %p1858_p10 = scmp.lt.s32.totalorder %s1330_s5, 12 }
  0x5d   : > { %s1605_s1 = scalar_lea.hbm %s1811_s2, %s832_s11  ;;  %s1617_s30 = scalar_lea.sflag [#allocation8], %s218_s13 }
  0x5e   : > { %p1613_p0 = pnand %p1858_p10, %p1551_p5  ;;  %s1134_s3 = scalar_lea.hbm %s1605_s1, 1024 }
  0x5f   : > { %p1135_p1 = scmp.ne.s32.totalorder %s1605_s1, %s1134_s3  ;;  %s1139_s7 = scalar_lea.hbm %s1811_s2, 6144 }
  0x60   : > { %p1136_p3 = pneg %p1613_p0  ;;  %p1140_p5 = scmp.lt.u32.totalorder %s1605_s1, %s1811_s2 }
  0x61   : > { %p1141_p7 = scmp.lt.u32.totalorder %s1139_s7, %s1134_s3  ;;  %p1143_p11 = scmp.lt.u32.totalorder %s1134_s3, %s1605_s1 }
  0x62   : > { %p1137_p8 = pnand %p1136_p3, %p1135_p1 }
  0x63   : > { %p1142_p9 = por %p1141_p7, %p1140_p5 }
  0x64   : > { %p1138_p4 = pneg %p1137_p8 }
  0x65   : > { %p1144_p10 = por %p1143_p11, %p1142_p9 }
  0x67   : > { %p1145_p13 = pnand %p1144_p10, %p1138_p4 }
  0x69   : > { %1148 = shalt.err (!%p1145_p13)
}
  0x6a   : > { %s1149_s13 = scalar_lea.vmem %s1607_s20, 1024  ;;  %s1336_s11 = smov [#allocation7]  }
  0x6b   : > { %p1150_p1 = scmp.ne.s32.totalorder %s1607_s20, %s1149_s13  ;;  %s1154_s25 = sshll.u32 %s1336_s11, 4  ;;  %s1155_s25 = int_to_ptr.vmem [resolvable:$false] %s1154_s25 }
  0x6c   : > { %s1156_s27 = scalar_lea.vmem %s1155_s25, 2048  ;;  %p1157_p12 = scmp.lt.s32.totalorder %s1607_s20, %s1155_s25 }
  0x6d   : > { %p1152_p8 = pnand %p1150_p1, %p1136_p3  ;;  %p1158_p5 = scmp.lt.s32.totalorder %s1156_s27, %s1149_s13 }
  0x6f   : > { %p1153_p2 = pneg %p1152_p8  ;;  %p1159_p7 = por %p1158_p5, %p1157_p12 }
  0x71   : > { %p1160_p9 = pnand %p1159_p7, %p1153_p2 }
  0x73   : > { %1163 = shalt.err (!%p1160_p9)
}
  0x74   : > { %s1337_s3 = smov 128   ;;  %s1860_s8 = smov 4  }
  0x75   : > { %s1861_s16 = smov 64   ;;  %249 = sbr.rel (%p1534_p6) target bundleno = 449 (0x1c1), region = 36 }
  0x76   : > { %943 = dma.hbm_to_vmem [thread:$0]  (!%p1613_p0), %s1605_s1, 1024, %s1607_s20, %s1617_s30, %s1337_s3, %s1861_s16, %s1860_s8  }
  0x77   : > { %s251_s7 = sand.u32 (!%p1534_p6), 1, %s1298_s0   ;;  %p1862_p12 = scmp.ne.s32.totalorder (!%p1534_p6), %s1841_s14, 0 }
  0x78   : > { %s834_s10 = sshll.u32 (!%p1534_p6), %s251_s7, 6  ;;  %s252_s4 = scalar_lea.sflag (!%p1534_p6), [#allocation5], %s251_s7 }
  0x79   : > { %s1650_s13 = scalar_lea.vmem (!%p1534_p6), [#allocation4], %s834_s10 }
  0x7c   : > { %1257 = dma.done.wait (%p1862_p12), %s252_s4, 1024  }
  0x7d   : > { %1259 = vsyncadd (%p1862_p12), %s252_s4, 4294966272  ;;  %s260_s23 = sand.u32 1, %s1286_s21   ;;  %p1863_p6 = scmp.ne.s32.totalorder %s1848_s9, 0 }
  0x7e   : > { %s835_s11 = sshll.u32 %s260_s23, 6  ;;  %s261_s20 = scalar_lea.sflag [#allocation8], %s260_s23 }
  0x7f   : > { %s1657_s1 = scalar_lea.vmem [#allocation7], %s835_s11 }
  0x80   : > { %1261 = dma.done.wait (%p1863_p6), %s261_s20, 1024  }
  0x81   : > { %1263 = vsyncadd (%p1863_p6), %s261_s20, 4294966272  ;;  %s1864_s15 = sld [smem:[#allocation14_spill]]  ;;  %s294_s30 = sand.u32 1, %s1274_s18  }
  0x82   : > { %s836_s14 = sshll.u32 %s294_s30, 7  ;;  %s1865_s3 = sld [smem:[#allocation23_spill]] }
  0x83   : > { %s1674_s16 = scalar_lea.vmem [#allocation9], %s836_s14  ;;  %s1866_s7 = sld [smem:[#allocation13_spill]] }
  0x87   : > { %p299_p2 = scmp.lt.s32.totalorder %s1864_s15, 1 }
  0x89   : > { %s1905_s15 = smov (!%p299_p2, %s1864_s15), 1  ;;  %p837_p13 = scmp.ne.s32.totalorder %s1866_s7, 0 }
  0x8a   : > { %s301_s8 = scalar_lea.vmem %s1865_s3, %s1905_s15  ;;  %v1338_v0 = vmov (!%p837_p13), 0.0  }
  0x8b   : > { %307 = sbr.rel (%p837_p13) target bundleno = 147 (0x93), region = 48  ;;  %308 = vst [vmem:[#allocation2] sm:$0xff] (!%p837_p13), %v1338_v0  ;;  %309 = vst [vmem:[#allocation2 + $0x8] sm:$0xff] (!%p837_p13), %v1338_v0 }
  0x8c   : > { %310 = vst [vmem:[#allocation2 + $0x10] sm:$0xff] (!%p837_p13), %v1338_v0  ;;  %311 = vst [vmem:[#allocation2 + $0x18] sm:$0xff] (!%p837_p13), %v1338_v0 }
  0x8d   : > { %312 = vst [vmem:[#allocation2 + $0x20] sm:$0xff] (!%p837_p13), %v1338_v0  ;;  %313 = vst [vmem:[#allocation2 + $0x28] sm:$0xff] (!%p837_p13), %v1338_v0 }
  0x8e   : > { %314 = vst [vmem:[#allocation2 + $0x30] sm:$0xff] (!%p837_p13), %v1338_v0  ;;  %315 = vst [vmem:[#allocation2 + $0x38] sm:$0xff] (!%p837_p13), %v1338_v0 }
  0x8f   : > { %316 = vst [vmem:[#allocation2 + $0x40] sm:$0xff] (!%p837_p13), %v1338_v0  ;;  %317 = vst [vmem:[#allocation2 + $0x48] sm:$0xff] (!%p837_p13), %v1338_v0 }
  0x90   : > { %318 = vst [vmem:[#allocation2 + $0x50] sm:$0xff] (!%p837_p13), %v1338_v0  ;;  %319 = vst [vmem:[#allocation2 + $0x58] sm:$0xff] (!%p837_p13), %v1338_v0 }
  0x91   : > { %320 = vst [vmem:[#allocation2 + $0x60] sm:$0xff] (!%p837_p13), %v1338_v0  ;;  %321 = vst [vmem:[#allocation2 + $0x68] sm:$0xff] (!%p837_p13), %v1338_v0 }
  0x92   : > { %322 = vst [vmem:[#allocation2 + $0x70] sm:$0xff] %v1338_v0  ;;  %323 = vst [vmem:[#allocation2 + $0x78] sm:$0xff] %v1338_v0 }
  0x93 PF: > { %v1086_v1 = vld [vmem:[%s1657_s1] sm:$0xff]   ;;  %v1087_v2 = vld [vmem:[%s1657_s1 + $0x8] sm:$0xff]   ;;  %v1088_v3 = vld [vmem:[%s1657_s1 + $0x10] sm:$0xff]   ;;  %s1867_s9 = sld [smem:[#allocation13_spill]] }
  0x94   : > { %880 = vmatprep.subr.bf16.mxu0 %v1086_v1  ;;  %912 = vmatprep.subr.bf16.mxu1 %v1086_v1  ;;  %v1089_v4 = vld [vmem:[%s1657_s1 + $0x18] sm:$0xff]   ;;  %v1094_v5 = vld [vmem:[%s1650_s13] sm:$0xff]   ;;  %v1091_v8 = vld [vmem:[%s1657_s1 + $0x28] sm:$0xff]  }
  0x95   : > { %881 = vmatpush3.bf16.msra.mxu0 %v1086_v1  ;;  %920 = vmatpush3.bf16.msra.mxu1 %v1086_v1  ;;  %v1095_v6 = vld [vmem:[%s1650_s13 + $0x20] sm:$0xff]   ;;  %v1092_v9 = vld [vmem:[%s1657_s1 + $0x30] sm:$0xff]   ;;  %v1093_v10 = vld [vmem:[%s1657_s1 + $0x38] sm:$0xff]  }
  0x96   : > { %882 = vmatprep.subr.bf16.mxu0 %v1087_v2  ;;  %913 = vmatprep.subr.bf16.mxu1 %v1087_v2  ;;  %v1090_v7 = vld [vmem:[%s1657_s1 + $0x20] sm:$0xff]   ;;  %v1096_v11 = vld [vmem:[%s1650_s13 + $0x8] sm:$0xff]   ;;  %v1098_v13 = vld [vmem:[%s1650_s13 + $0x10] sm:$0xff]  }
  0x97   : > { %896 = vmatprep.mubr.bf16.mxu0 %v1094_v5  ;;  %904 = vmatprep.mubr.bf16.mxu1 %v1095_v6  ;;  %v1097_v12 = vld [vmem:[%s1650_s13 + $0x28] sm:$0xff]   ;;  %v1099_v14 = vld [vmem:[%s1650_s13 + $0x30] sm:$0xff]   ;;  %v1100_v15 = vld [vmem:[%s1650_s13 + $0x18] sm:$0xff]  }
  0x98   : > { %v1101_v16 = vld [vmem:[%s1650_s13 + $0x38] sm:$0xff]   ;;  %v326_v17 = vld [vmem:[#allocation2 + $0x10] sm:$0xff]  ;;  %v324_v19 = vld [vmem:[#allocation2] sm:$0xff] }
  0x99   : > { %883 = vmatpush3.bf16.msra.mxu0 %v1087_v2  ;;  %921 = vmatpush3.bf16.msra.mxu1 %v1087_v2  ;;  %v334_v18 = vld [vmem:[#allocation2 + $0x50] sm:$0xff]  ;;  %v332_v20 = vld [vmem:[#allocation2 + $0x40] sm:$0xff]  ;;  %v327_v23 = vld [vmem:[#allocation2 + $0x18] sm:$0xff]  ;;  %p854_p0 = scmp.ne.s32.totalorder %s1867_s9, 2 }
  0x9a   : > { %884 = vmatprep.subr.bf16.mxu0 %v1088_v3  ;;  %914 = vmatprep.subr.bf16.mxu1 %v1088_v3  ;;  %v335_v24 = vld [vmem:[#allocation2 + $0x58] sm:$0xff]  ;;  %v325_v29 = vld [vmem:[#allocation2 + $0x8] sm:$0xff]  ;;  %v330_v41 = vld [vmem:[#allocation2 + $0x30] sm:$0xff]  ;;  %s601_s10 = sld [smem:[#allocation3]] (!%p854_p0) }
  0x9b   : > { %v333_v30 = vld [vmem:[#allocation2 + $0x48] sm:$0xff]  ;;  %v338_v42 = vld [vmem:[#allocation2 + $0x70] sm:$0xff]  ;;  %v328_v43 = vld [vmem:[#allocation2 + $0x20] sm:$0xff] }
  0x9c   : > { %v336_v44 = vld [vmem:[#allocation2 + $0x60] sm:$0xff]  ;;  %v331_v47 = vld [vmem:[#allocation2 + $0x38] sm:$0xff]  ;;  %v329_v53 = vld [vmem:[#allocation2 + $0x28] sm:$0xff] }
  0x9d   : > { %885 = vmatpush3.bf16.msra.mxu0 %v1088_v3  ;;  %922 = vmatpush3.bf16.msra.mxu1 %v1088_v3  ;;  %v339_v48 = vld [vmem:[#allocation2 + $0x78] sm:$0xff]  ;;  %v337_v54 = vld [vmem:[#allocation2 + $0x68] sm:$0xff] }
  0x9e   : > { %886 = vmatprep.subr.bf16.mxu0 %v1089_v4  ;;  %915 = vmatprep.subr.bf16.mxu1 %v1089_v4 }
  0xa0   : > { %v602_v1 = vstv (!%p854_p0), %s601_s10 }
  0xa1   : > { %887 = vmatpush3.bf16.msra.mxu0 %v1089_v4  ;;  %923 = vmatpush3.bf16.msra.mxu1 %v1089_v4  ;;  %1102 = vrcp.f32 (!%p854_p0), %v602_v1 }
  0xa2   : > { %888 = vmatprep.subr.bf16.mxu0 %v1090_v7  ;;  %916 = vmatprep.subr.bf16.mxu1 %v1090_v7 }
  0xa5   : > { %889 = vmatpush3.bf16.msra.mxu0 %v1090_v7  ;;  %924 = vmatpush3.bf16.msra.mxu1 %v1090_v7  ;;  %v855_v7 = vld [vmem:[%s301_s8] ss:$0 sm:$0xff] (!%p854_p0) }
  0xa6   : > { %890 = vmatprep.subr.bf16.mxu0 %v1091_v8  ;;  %917 = vmatprep.subr.bf16.mxu1 %v1091_v8 }
  0xa9   : > { %891 = vmatpush3.bf16.msra.mxu0 %v1091_v8  ;;  %925 = vmatpush3.bf16.msra.mxu1 %v1091_v8 }
  0xaa   : > { %892 = vmatprep.subr.bf16.mxu0 %v1092_v9  ;;  %918 = vmatprep.subr.bf16.mxu1 %v1092_v9 }
  0xab   : > { %v1103_v2 = vpop.eup (!%p854_p0), %1102 }
  0xac   : > { %929 = vpush (!%p854_p0), %v1103_v2 }
  0xad   : > { %893 = vmatpush3.bf16.msra.mxu0 %v1092_v9  ;;  %926 = vmatpush3.bf16.msra.mxu1 %v1092_v9 }
  0xae   : > { %894 = vmatprep.subr.bf16.mxu0 %v1093_v10  ;;  %919 = vmatprep.subr.bf16.mxu1 %v1093_v10 }
  0xb1   : > { %895 = vmatpush3.bf16.msra.mxu0 %v1093_v10  ;;  %927 = vmatpush3.bf16.msra.mxu1 %v1093_v10 }
  0xb4   : > { %897 = vmatmul.mubr.bf16.vlgmr.msra.gmra.mrb[0].mxu0 %v1096_v11  ;;  %905 = vmatmul.mubr.bf16.vlgmr.msra.gmra.mrb[0].mxu1 %v1097_v12 }
  0xb5   : > { %900 = vmatprep.mubr.bf16.mxu0 %v1098_v13  ;;  %908 = vmatprep.mubr.bf16.mxu1 %v1099_v14 }
  0xbc   : > { %901 = vmatmul.mubr.bf16.gmra.mrb[4].mxu0 %v1100_v15  ;;  %909 = vmatmul.mubr.bf16.gmra.mrb[4].mxu1 %v1101_v16 }
  0xdd   : > { %s930_s11 = spop (!%p854_p0), %929 }
 0x187   : > { %v898_v21 = vpop.f32.mrb[0].mxu0  ;;  %v906_v22 = vpop.f32.mrb[0].mxu1 }
 0x188   : > { %v567_v25 = vadd.f32 %v898_v21, %v326_v17  ;;  %v575_v26 = vadd.f32 %v906_v22, %v334_v18  ;;  %v502_v27 = vpop.f32.mrb[1].mxu0  ;;  %v534_v28 = vpop.f32.mrb[1].mxu1 }
 0x189   : > { %v565_v31 = vadd.f32 %v502_v27, %v324_v19  ;;  %v573_v32 = vadd.f32 %v534_v28, %v332_v20  ;;  %v899_v33 = vpop.f32.mrb[2].mxu0  ;;  %v907_v34 = vpop.f32.mrb[2].mxu1 }
 0x18a   : > { %583 = vst [vmem:[#allocation2 + $0x10] sm:$0xff] %v567_v25  ;;  %591 = vst [vmem:[#allocation2 + $0x50] sm:$0xff] %v575_v26  ;;  %v568_v35 = vadd.f32 %v899_v33, %v327_v23  ;;  %v576_v36 = vadd.f32 %v907_v34, %v335_v24  ;;  %v505_v37 = vpop.f32.mrb[3].mxu0  ;;  %v537_v38 = vpop.f32.mrb[3].mxu1 }
 0x18b   : > { %581 = vst [vmem:[#allocation2] sm:$0xff] %v565_v31  ;;  %589 = vst [vmem:[#allocation2 + $0x40] sm:$0xff] %v573_v32  ;;  %v566_v39 = vadd.f32 %v505_v37, %v325_v29  ;;  %v574_v40 = vadd.f32 %v537_v38, %v333_v30 }
 0x18c   : > { %584 = vst [vmem:[#allocation2 + $0x18] sm:$0xff] %v568_v35  ;;  %592 = vst [vmem:[#allocation2 + $0x58] sm:$0xff] %v576_v36  ;;  %v644_v36 = vstv (!%p854_p0), %s930_s11 }
 0x18d   : > { %582 = vst [vmem:[#allocation2 + $0x8] sm:$0xff] %v566_v39  ;;  %590 = vst [vmem:[#allocation2 + $0x48] sm:$0xff] %v574_v40 }
 0x18f   : > { %v902_v45 = vpop.f32.mrb[4].mxu0  ;;  %v910_v46 = vpop.f32.mrb[4].mxu1  ;;  %600 = sbr.rel (%p854_p0) target bundleno = 419 (0x1a3), region = 52 }
 0x190   : > { %v571_v49 = vadd.f32 %v902_v45, %v330_v41  ;;  %v579_v50 = vadd.f32 %v910_v46, %v338_v42  ;;  %v518_v51 = vpop.f32.mrb[5].mxu0  ;;  %v550_v52 = vpop.f32.mrb[5].mxu1 }
 0x191   : > { %v569_v55 = vadd.f32 %v518_v51, %v328_v43  ;;  %v577_v56 = vadd.f32 %v550_v52, %v336_v44  ;;  %v903_v57 = vpop.f32.mrb[6].mxu0  ;;  %v911_v58 = vpop.f32.mrb[6].mxu1  ;;  %v607_v5 = vld [vmem:[#allocation2 + $0x10] sm:$0xff] (!%p854_p0) }
 0x192   : > { %587 = vst [vmem:[#allocation2 + $0x30] sm:$0xff] %v571_v49  ;;  %595 = vst [vmem:[#allocation2 + $0x70] sm:$0xff] %v579_v50  ;;  %v572_v59 = vadd.f32 %v903_v57, %v331_v47  ;;  %v580_v60 = vadd.f32 %v911_v58, %v339_v48  ;;  %v521_v61 = vpop.f32.mrb[7].mxu0  ;;  %v553_v62 = vpop.f32.mrb[7].mxu1  ;;  %v605_v3 = vld [vmem:[#allocation2] sm:$0xff] (!%p854_p0)  ;;  %v615_v14 = vld [vmem:[#allocation2 + $0x50] sm:$0xff] (!%p854_p0)  ;;  %v630_v22 = vadd.f32 (!%p854_p0), %v855_v7, %v607_v5 }
 0x193   : > { %585 = vst [vmem:[#allocation2 + $0x20] sm:$0xff] %v569_v55  ;;  %593 = vst [vmem:[#allocation2 + $0x60] sm:$0xff] %v577_v56  ;;  %v570_v63 = vadd.f32 %v521_v61, %v329_v53  ;;  %v578_v0 = vadd.f32 %v553_v62, %v337_v54  ;;  %v608_v6 = vld [vmem:[#allocation2 + $0x18] sm:$0xff] (!%p854_p0)  ;;  %v613_v12 = vld [vmem:[#allocation2 + $0x40] sm:$0xff] (!%p854_p0)  ;;  %v628_v17 = vadd.f32 (!%p854_p0), %v855_v7, %v605_v3 }
 0x194   : > { %588 = vst [vmem:[#allocation2 + $0x38] sm:$0xff] %v572_v59  ;;  %596 = vst [vmem:[#allocation2 + $0x78] sm:$0xff] %v580_v60  ;;  %v606_v4 = vld [vmem:[#allocation2 + $0x8] sm:$0xff] (!%p854_p0)  ;;  %v616_v15 = vld [vmem:[#allocation2 + $0x58] sm:$0xff] (!%p854_p0)  ;;  %v631_v23 = vadd.f32 (!%p854_p0), %v855_v7, %v608_v6  ;;  %v636_v28 = vadd.f32 (!%p854_p0), %v855_v7, %v613_v12  ;;  %v638_v30 = vadd.f32 (!%p854_p0), %v855_v7, %v615_v14 }
 0x195   : > { %586 = vst [vmem:[#allocation2 + $0x28] sm:$0xff] %v570_v63  ;;  %594 = vst [vmem:[#allocation2 + $0x68] sm:$0xff] %v578_v0  ;;  %v614_v13 = vld [vmem:[#allocation2 + $0x48] sm:$0xff] (!%p854_p0)  ;;  %v629_v21 = vadd.f32 (!%p854_p0), %v855_v7, %v606_v4  ;;  %v639_v31 = vadd.f32 (!%p854_p0), %v855_v7, %v616_v15  ;;  %v645_v37 = vmul.f32 (!%p854_p0), %v644_v36, %v628_v17 }
 0x196   : > { %v637_v29 = vadd.f32 %v855_v7, %v614_v13  ;;  %v647_v39 = vmul.f32 %v644_v36, %v630_v22  ;;  %v648_v40 = vmul.f32 %v644_v36, %v631_v23  ;;  %v653_v45 = vmul.f32 %v644_v36, %v636_v28 }
 0x197   : > { %v646_v38 = vmul.f32 %v644_v36, %v629_v21  ;;  %v655_v47 = vmul.f32 %v644_v36, %v638_v30  ;;  %v656_v48 = vmul.f32 %v644_v36, %v639_v31  ;;  %661 = vst [vmem:[%s1674_s16] sm:$0xff] %v645_v37 }
 0x198   : > { %v654_v46 = vmul.f32 %v644_v36, %v637_v29  ;;  %663 = vst [vmem:[%s1674_s16 + $0x10] sm:$0xff] %v647_v39  ;;  %664 = vst [vmem:[%s1674_s16 + $0x18] sm:$0xff] %v648_v40 }
 0x199   : > { %v611_v10 = vld [vmem:[#allocation2 + $0x30] sm:$0xff]  ;;  %662 = vst [vmem:[%s1674_s16 + $0x8] sm:$0xff] %v646_v38  ;;  %669 = vst [vmem:[%s1674_s16 + $0x40] sm:$0xff] %v653_v45 }
 0x19a   : > { %v609_v8 = vld [vmem:[#allocation2 + $0x20] sm:$0xff]  ;;  %v619_v19 = vld [vmem:[#allocation2 + $0x70] sm:$0xff]  ;;  %v634_v26 = vadd.f32 %v855_v7, %v611_v10  ;;  %670 = vst [vmem:[%s1674_s16 + $0x48] sm:$0xff] %v654_v46  ;;  %671 = vst [vmem:[%s1674_s16 + $0x50] sm:$0xff] %v655_v47 }
 0x19b   : > { %v612_v11 = vld [vmem:[#allocation2 + $0x38] sm:$0xff]  ;;  %v617_v16 = vld [vmem:[#allocation2 + $0x60] sm:$0xff]  ;;  %v632_v24 = vadd.f32 %v855_v7, %v609_v8  ;;  %v642_v34 = vadd.f32 %v855_v7, %v619_v19  ;;  %672 = vst [vmem:[%s1674_s16 + $0x58] sm:$0xff] %v656_v48 }
 0x19c   : > { %v610_v9 = vld [vmem:[#allocation2 + $0x28] sm:$0xff]  ;;  %v620_v20 = vld [vmem:[#allocation2 + $0x78] sm:$0xff]  ;;  %v635_v27 = vadd.f32 %v855_v7, %v612_v11  ;;  %v640_v32 = vadd.f32 %v855_v7, %v617_v16  ;;  %v651_v43 = vmul.f32 %v644_v36, %v634_v26 }
 0x19d   : > { %v618_v18 = vld [vmem:[#allocation2 + $0x68] sm:$0xff]  ;;  %v633_v25 = vadd.f32 %v855_v7, %v610_v9  ;;  %v643_v35 = vadd.f32 %v855_v7, %v620_v20  ;;  %v649_v41 = vmul.f32 %v644_v36, %v632_v24  ;;  %v659_v51 = vmul.f32 %v644_v36, %v642_v34 }
 0x19e   : > { %v641_v33 = vadd.f32 %v855_v7, %v618_v18  ;;  %v652_v44 = vmul.f32 %v644_v36, %v635_v27  ;;  %v657_v49 = vmul.f32 %v644_v36, %v640_v32  ;;  %667 = vst [vmem:[%s1674_s16 + $0x30] sm:$0xff] %v651_v43 }
 0x19f   : > { %v650_v42 = vmul.f32 %v644_v36, %v633_v25  ;;  %v660_v52 = vmul.f32 %v644_v36, %v643_v35  ;;  %665 = vst [vmem:[%s1674_s16 + $0x20] sm:$0xff] %v649_v41  ;;  %675 = vst [vmem:[%s1674_s16 + $0x70] sm:$0xff] %v659_v51 }
 0x1a0   : > { %v658_v50 = vmul.f32 %v644_v36, %v641_v33  ;;  %668 = vst [vmem:[%s1674_s16 + $0x38] sm:$0xff] %v652_v44  ;;  %673 = vst [vmem:[%s1674_s16 + $0x60] sm:$0xff] %v657_v49 }
 0x1a1   : > { %666 = vst [vmem:[%s1674_s16 + $0x28] sm:$0xff] %v650_v42  ;;  %676 = vst [vmem:[%s1674_s16 + $0x78] sm:$0xff] %v660_v52 }
 0x1a2   : > { %674 = vst [vmem:[%s1674_s16 + $0x68] sm:$0xff] %v658_v50 }
 0x1a3 PF: > { %s1869_s20 = sld [smem:[#allocation15_spill]]  ;;  %s1870_s1 = sld [smem:[#allocation14_spill]] }
 0x1a4   : > { %s1871_s15 = sld [smem:[#allocation19_spill]]  ;;  %s693_s27 = sshll.u32 %s1674_s16, 4  ;;  %s1718_s27 = int_to_ptr.vmem [resolvable:$true] %s693_s27 }
 0x1a5   : > { %s1872_s9 = sld [smem:[#allocation24_spill]]  ;;  %s1727_s4 = scalar_lea.sflag [#allocation6], %s294_s30 }
 0x1a6   : > { %s1164_s13 = scalar_lea.vmem %s1718_s27, 2048  ;;  %s1339_s16 = smov [#allocation9]  }
 0x1a7   : > { %p1165_p3 = scmp.ne.s32.totalorder %s1718_s27, %s1164_s13  ;;  %s1168_s23 = sshll.u32 %s1339_s16, 4  ;;  %s1169_s23 = int_to_ptr.vmem [resolvable:$false] %s1168_s23 }
 0x1a8   : > { %s1170_s11 = scalar_lea.vmem %s1169_s23, 4096  ;;  %p1171_p1 = scmp.lt.s32.totalorder %s1718_s27, %s1169_s23 }
 0x1a9   : > { %s863_s14 = sshll.u32 %s1869_s20, 5  ;;  %p1172_p8 = scmp.lt.s32.totalorder %s1170_s11, %s1164_s13 }
 0x1aa   : > { %s690_s25 = sadd.s32 %s1870_s1, %s863_s14  ;;  %p1873_p4 = scmp.ne.s32.totalorder %s1871_s15, 0 }
 0x1ab   : > { %s859_s3 = sshll.u32 %s690_s25, 7  ;;  %p1173_p5 = por %p1172_p8, %p1171_p1 }
 0x1ac   : > { %s1723_s10 = scalar_lea.hbm %s1872_s9, %s859_s3  ;;  %p1166_p11 = pnand %p1165_p3, %p1873_p4 }
 0x1ae   : > { %p1167_p10 = pneg %p1166_p11 }
 0x1b0   : > { %p1174_p7 = pnand %p1173_p5, %p1167_p10 }
 0x1b2   : > { %1177 = shalt.err (!%p1174_p7)
}
 0x1b3   : > { %s1178_s30 = scalar_lea.hbm %s1723_s10, 2048  ;;  %s1182_s14 = scalar_lea.hbm %s1872_s9, 8192 }
 0x1b4   : > { %p1179_p9 = scmp.ne.s32.totalorder %s1723_s10, %s1178_s30  ;;  %p1183_p2 = scmp.lt.u32.totalorder %s1723_s10, %s1872_s9 }
 0x1b5   : > { %p1184_p13 = scmp.lt.u32.totalorder %s1182_s14, %s1178_s30  ;;  %p1186_p3 = scmp.lt.u32.totalorder %s1178_s30, %s1723_s10 }
 0x1b6   : > { %p1180_p12 = pnand %p1179_p9, %p1873_p4 }
 0x1b7   : > { %p1185_p0 = por %p1184_p13, %p1183_p2 }
 0x1b8   : > { %p1181_p6 = pneg %p1180_p12 }
 0x1b9   : > { %p1187_p11 = por %p1186_p3, %p1185_p0 }
 0x1bb   : > { %p1188_p10 = pnand %p1187_p11, %p1181_p6 }
 0x1bd   : > { %1191 = shalt.err (!%p1188_p10)
}
 0x1be   : > { %s1340_s8 = smov 128   ;;  %s1341_s7 = smov 256  }
 0x1bf   : > { %s1342_s13 = smov 8  }
 0x1c0   : > { %935 = dma.vmem_to_hbm [thread:$0]  (%p1873_p4), %s1718_s27, 2048, %s1723_s10, %s1727_s4, %s1340_s8, %s1341_s7, %s1342_s13  }
 0x1c1 PF: > { %p949_p1 = scmp.ge.s32.totalorder %s1330_s5, 2  ;;  %s708_s16 = sand.u32 1, %s1270_s17  }
 0x1c2   : > { %p1874_p8 = scmp.ne.s32.totalorder %s1857_s26, 0  ;;  %s709_s23 = scalar_lea.sflag [#allocation6], %s708_s16 }
 0x1c4   : > { %p945_p5 = pnand %p949_p1, %p1874_p8 }
 0x1c6   : > { %1265 = dma.done.wait (!%p945_p5), %s709_s23, 2048  }
 0x1c7   : > { %1267 = vsyncadd (!%p945_p5), %s709_s23, 4294965248  ;;  %s24_s5 = sadd.s32 1, %s1330_s5   ;;  %s1876_s15 = sld [smem:[#allocation21_spill]] }
 0x1c8   : > { %p1756_p7 = scmp.ge.s32.totalorder %s24_s5, 14   ;;  %s1877_s27 = sld [smem:[#allocation16_spill]] }
 0x1c9   : > { %s1878_s10 = sld [smem:[#allocation17_spill]]  ;;  %s1879_s4 = sld [smem:[#allocation18_spill]] }
 0x1ca   : > { %s1880_s30 = sld [smem:[#allocation20_spill]]  ;;  %s1881_s17 = smov %s1274_s18 }
 0x1cb   : > { %s1882_s18 = smov %s1278_s19  ;;  %s1883_s19 = smov %s1594_s12 }
 0x1cc   : > { %s1884_s20 = smov %s1286_s21  ;;  %s1885_s21 = smov %s1290_s22 }
 0x1cd   : > { %s1886_s22 = smov %s1876_s15  ;;  %s1887_s23 = smov %s1298_s0 }
 0x1ce   : > { %s1888_s0 = smov %s1302_s24  ;;  %s1889_s24 = smov %s1591_s6 }
 0x1cf   : > { %s1890_s25 = smov %s1318_s28  ;;  %s1891_s26 = smov %s1322_s29 }
 0x1d0   : > { %s1892_s28 = smov %s1878_s10  ;;  %s1893_s29 = smov %s1879_s4 }
 0x1d1   :  { %23 = sbr.rel (!%p1756_p7) target bundleno = 18 (0x12), region = 105 }
 0x1d8   :  { %714 = vsyncpa [#allocation5], 1 }
 0x1d9   :  { %716 = vsyncpa [#allocation5 + $0x1], 1 }
 0x1da   :  { %717 = vsyncpa [#allocation8], 1 }
 0x1db   :  { %719 = vsyncpa [#allocation8 + $0x1], 1 }
 0x1dc   :  { %720 = vsyncpa [#allocation6], 1 }
 0x1dd   :  { %722 = vsyncpa [#allocation6 + $0x1], 1 }

</bundles_post_ra>
